<compile_context>
chip_gen: v5e
topology: v5e:2x2
jax: 0.10.0
libtpu: 0.0.40
codegen_flags: <defaults>
</compile_context>

<pallas_src>
import functools

import jax
import jax.numpy as jnp
from jax.experimental import pallas as pl
from jax.experimental.pallas import tpu as pltpu

DIMS = [96, 192, 384, 768]        # ConvNeXt-T dims
DEPTHS = [3, 3, 9, 3]             # ConvNeXt-T depths
CHANNELS = [96, 192, 384, 768]
TXT_DIM = 768
VOCAB = 1000                      # synthetic vocab for the BERT stand-in
MAX_POS = 64

_FUSED_VMEM = 40 * 1024 * 1024    # scoped-VMEM ceiling for the fused kernels


def _round_up(x, m):
    return (x + m - 1) // m * m


# ----------------------------------------------------------------------------
# Tiled matmul (bf16 operands, f32 accumulation, fused bias + activation)
# ----------------------------------------------------------------------------

def _mm_kernel(act, nk):
    def kernel(a_ref, b_ref, bias_ref, o_ref, acc_ref):
        @pl.when(pl.program_id(2) == 0)
        def _():
            acc_ref[...] = jnp.zeros_like(acc_ref)

        acc_ref[...] += jnp.dot(a_ref[...], b_ref[...],
                                preferred_element_type=jnp.float32)

        @pl.when(pl.program_id(2) == nk - 1)
        def _():
            acc = acc_ref[...] + bias_ref[...]
            if act == "gelu":
                # TODO(synk): nn.GELU default is exact erf; tanh approximation used here.
                acc = jax.nn.gelu(acc, approximate=True)
            elif act == "relu":
                acc = jnp.maximum(acc, 0.0)
            elif act == "sigmoid":
                acc = 1.0 / (1.0 + jnp.exp(-acc))
            o_ref[...] = acc
    return kernel


@functools.partial(jax.jit, static_argnames=("act",))
def pallas_matmul(a, b, bias, act="none"):
    """(M,K) @ (K,N) + bias with optional fused activation, tiled grid."""
    M, K = a.shape
    _, N = b.shape
    Mp = _round_up(M, 8)
    Np = _round_up(N, 128)
    Kp = _round_up(K, 128)
    tm = Mp if Mp <= 512 else 256
    tn = Np if Np <= 512 else 256
    tk = Kp if Kp <= 2048 else 512
    Mp = _round_up(Mp, tm)
    Np = _round_up(Np, tn)
    Kp = _round_up(Kp, tk)
    nk = Kp // tk
    a_p = jnp.pad(a.astype(jnp.bfloat16), ((0, Mp - M), (0, Kp - K)))
    b_p = jnp.pad(b.astype(jnp.bfloat16), ((0, Kp - K), (0, Np - N)))
    bias_p = jnp.pad(bias.astype(jnp.float32).reshape(1, N), ((0, 0), (0, Np - N)))
    out = pl.pallas_call(
        _mm_kernel(act, nk),
        grid=(Mp // tm, Np // tn, nk),
        in_specs=[
            pl.BlockSpec((tm, tk), lambda i, j, k: (i, k)),
            pl.BlockSpec((tk, tn), lambda i, j, k: (k, j)),
            pl.BlockSpec((1, tn), lambda i, j, k: (0, j)),
        ],
        out_specs=pl.BlockSpec((tm, tn), lambda i, j, k: (i, j)),
        out_shape=jax.ShapeDtypeStruct((Mp, Np), jnp.float32),
        scratch_shapes=[pltpu.VMEM((tm, tn), jnp.float32)],
        compiler_params=pltpu.CompilerParams(
            dimension_semantics=("parallel", "parallel", "arbitrary")),
    )(a_p, b_p, bias_p)
    return out[:M, :N]


# ----------------------------------------------------------------------------
# LayerNorm kernel (small tensors, single block)
# ----------------------------------------------------------------------------

def _ln_kernel(eps):
    def kernel(x_ref, w_ref, b_ref, o_ref):
        x = x_ref[...]
        mu = jnp.mean(x, axis=-1, keepdims=True)
        xc = x - mu
        var = jnp.mean(xc * xc, axis=-1, keepdims=True)
        o_ref[...] = xc * jax.lax.rsqrt(var + eps) * w_ref[...] + b_ref[...]
    return kernel


@jax.jit
def pallas_layernorm(x2d, w, b):
    M, C = x2d.shape
    return pl.pallas_call(
        _ln_kernel(1e-6),
        grid=(1,),
        in_specs=[
            pl.BlockSpec((M, C), lambda i: (0, 0)),
            pl.BlockSpec((1, C), lambda i: (0, 0)),
            pl.BlockSpec((1, C), lambda i: (0, 0)),
        ],
        out_specs=pl.BlockSpec((M, C), lambda i: (0, 0)),
        out_shape=jax.ShapeDtypeStruct((M, C), jnp.float32),
        compiler_params=pltpu.CompilerParams(dimension_semantics=("arbitrary",)),
    )(x2d.astype(jnp.float32), w.reshape(1, C).astype(jnp.float32),
      b.reshape(1, C).astype(jnp.float32))


# ----------------------------------------------------------------------------
# Fused ConvNeXt block kernel
#   Works on the flattened, zero-padded image: row (b, hp, wp) -> b*Hp*Wp +
#   hp*Wp + wp, so the depthwise 7x7 tap (dy,dx) is a flat row shift of
#   dy*Wp+dx.  Junk rows (padding positions) are computed and discarded by the
#   wrapper; this keeps every op in the kernel strictly 2-D.
# ----------------------------------------------------------------------------

def _convnext_block_kernel(Mout, Wp):
    def kernel(x_ref, dww_ref, dwb_ref, lnw_ref, lnb_ref,
               w1_ref, b1_ref, w2_ref, b2_ref, g_ref, o_ref):
        x = x_ref[...]                       # (Min, C) f32, flat padded image
        dww = dww_ref[...]                   # (7, 7, C)
        acc = jnp.zeros(o_ref.shape, jnp.float32)
        for dy in range(7):                  # depthwise 7x7 via flat row shifts
            for dx in range(7):
                off = dy * Wp + dx
                acc = acc + x[off:off + Mout, :] * dww[dy, dx, :]
        y = acc + dwb_ref[...]
        # LayerNorm over channels (eps 1e-6), stats kept in f32
        mu = jnp.mean(y, axis=-1, keepdims=True)
        yc = y - mu
        var = jnp.mean(yc * yc, axis=-1, keepdims=True)
        y = yc * jax.lax.rsqrt(var + 1e-6) * lnw_ref[...] + lnb_ref[...]
        # pointwise MLP (bf16 MXU, f32 accumulation)
        h = jnp.dot(y.astype(jnp.bfloat16), w1_ref[...],
                    preferred_element_type=jnp.float32) + b1_ref[...]
        # TODO(synk): nn.GELU default is exact erf; tanh approximation used here.
        h = jax.nn.gelu(h, approximate=True)
        h = jnp.dot(h.astype(jnp.bfloat16), w2_ref[...],
                    preferred_element_type=jnp.float32) + b2_ref[...]
        h = h * g_ref[...]                                   # layer scale
        res = x[3 * Wp + 3:3 * Wp + 3 + Mout, :]             # residual = center tap
        o_ref[...] = res + h
    return kernel


@jax.jit
def pallas_convnext_block(x, dww, dwb, lnw, lnb, w1, b1, w2, b2, g):
    """Fused ConvNeXt block: dwconv7 + LN + pw1/GELU + pw2 + layerscale + residual."""
    B, H, W, C = x.shape
    Hp, Wp = H + 6, W + 6
    Mout = B * Hp * Wp
    Min = Mout + _round_up(6 * Wp + 8, 8)
    xflat = jnp.pad(x, ((0, 0), (3, 3), (3, 3), (0, 0))).astype(jnp.float32)
    xflat = xflat.reshape(Mout, C)
    xflat = jnp.pad(xflat, ((0, Min - Mout), (0, 0)))
    out = pl.pallas_call(
        _convnext_block_kernel(Mout, Wp),
        grid=(1,),
        in_specs=[
            pl.BlockSpec((Min, C), lambda i: (0, 0)),
            pl.BlockSpec((7, 7, C), lambda i: (0, 0, 0)),
            pl.BlockSpec((1, C), lambda i: (0, 0)),
            pl.BlockSpec((1, C), lambda i: (0, 0)),
            pl.BlockSpec((1, C), lambda i: (0, 0)),
            pl.BlockSpec((C, 4 * C), lambda i: (0, 0)),
            pl.BlockSpec((1, 4 * C), lambda i: (0, 0)),
            pl.BlockSpec((4 * C, C), lambda i: (0, 0)),
            pl.BlockSpec((1, C), lambda i: (0, 0)),
            pl.BlockSpec((1, C), lambda i: (0, 0)),
        ],
        out_specs=pl.BlockSpec((Mout, C), lambda i: (0, 0)),
        out_shape=jax.ShapeDtypeStruct((Mout, C), jnp.float32),
        compiler_params=pltpu.CompilerParams(
            dimension_semantics=("arbitrary",),
            vmem_limit_bytes=_FUSED_VMEM),
    )(xflat,
      dww.astype(jnp.float32), dwb.reshape(1, C).astype(jnp.float32),
      lnw.reshape(1, C).astype(jnp.float32), lnb.reshape(1, C).astype(jnp.float32),
      w1.astype(jnp.bfloat16), b1.reshape(1, 4 * C).astype(jnp.float32),
      w2.astype(jnp.bfloat16), b2.reshape(1, C).astype(jnp.float32),
      g.reshape(1, C).astype(jnp.float32))
    return out.reshape(B, Hp, Wp, C)[:, :H, :W, :]


# ----------------------------------------------------------------------------
# 3x3 stride-1 conv with in-kernel tap accumulation (replaces im2col)
# ----------------------------------------------------------------------------

def _conv3x3_kernel(Mout, Wp, act):
    def kernel(x_ref, w_ref, b_ref, o_ref):
        x = x_ref[...]                       # (Min, Cin) f32, flat padded image
        acc = jnp.zeros(o_ref.shape, jnp.float32)
        for dy in range(3):                  # 9 taps accumulated in VMEM
            for dx in range(3):
                off = dy * Wp + dx
                acc = acc + jnp.dot(x[off:off + Mout, :].astype(jnp.bfloat16),
                                    w_ref[dy * 3 + dx],
                                    preferred_element_type=jnp.float32)
        acc = acc + b_ref[...]
        if act == "relu":
            acc = jnp.maximum(acc, 0.0)
        o_ref[...] = acc
    return kernel


@functools.partial(jax.jit, static_argnames=("act",))
def pallas_conv3x3(x, w, b, act="none"):
    """3x3 / stride 1 / pad 1 conv, NHWC.  w: (9, Cin, Cout), b: (Cout,)."""
    B, H, W, Cin = x.shape
    Cout = w.shape[-1]
    Hp, Wp = H + 2, W + 2
    Mout = B * Hp * Wp
    Min = Mout + _round_up(2 * Wp + 4, 8)
    xflat = jnp.pad(x, ((0, 0), (1, 1), (1, 1), (0, 0))).astype(jnp.float32)
    xflat = xflat.reshape(Mout, Cin)
    xflat = jnp.pad(xflat, ((0, Min - Mout), (0, 0)))
    out = pl.pallas_call(
        _conv3x3_kernel(Mout, Wp, act),
        grid=(1,),
        in_specs=[
            pl.BlockSpec((Min, Cin), lambda i: (0, 0)),
            pl.BlockSpec((9, Cin, Cout), lambda i: (0, 0, 0)),
            pl.BlockSpec((1, Cout), lambda i: (0, 0)),
        ],
        out_specs=pl.BlockSpec((Mout, Cout), lambda i: (0, 0)),
        out_shape=jax.ShapeDtypeStruct((Mout, Cout), jnp.float32),
        compiler_params=pltpu.CompilerParams(
            dimension_semantics=("arbitrary",),
            vmem_limit_bytes=_FUSED_VMEM),
    )(xflat, w.astype(jnp.bfloat16), b.reshape(1, Cout).astype(jnp.float32))
    return out.reshape(B, Hp, Wp, Cout)[:, :H, :W, :]


# ----------------------------------------------------------------------------
# Fused cross-attention kernel (QKV proj + softmax(QK^T/sqrt(C)) V + out proj)
# ----------------------------------------------------------------------------

def _xattn_kernel(B, scale):
    def kernel(xq_ref, xkv_ref, wq_ref, wk_ref, wv_ref, wo_ref, o_ref):
        wq = wq_ref[...]
        wk = wk_ref[...]
        wv = wv_ref[...]
        wo = wo_ref[...]
        for b in range(B):
            xq = xq_ref[b].astype(jnp.bfloat16)       # (M, C)
            xkv = xkv_ref[b].astype(jnp.bfloat16)     # (L, C)
            q = jnp.dot(xq, wq, preferred_element_type=jnp.float32)
            k = jnp.dot(xkv, wk, preferred_element_type=jnp.float32)
            v = jnp.dot(xkv, wv, preferred_element_type=jnp.float32)
            s = jax.lax.dot_general(
                q.astype(jnp.bfloat16), k.astype(jnp.bfloat16),
                (((1,), (1,)), ((), ())),
                preferred_element_type=jnp.float32) * scale           # (M, L)
            s = s - jnp.max(s, axis=-1, keepdims=True)
            e = jnp.exp(s)
            p = e * pl.reciprocal(jnp.sum(e, axis=-1, keepdims=True), approx=True)
            ctx = jnp.dot(p.astype(jnp.bfloat16), v.astype(jnp.bfloat16),
                          preferred_element_type=jnp.float32)
            o_ref[b] = jnp.dot(ctx.astype(jnp.bfloat16), wo,
                               preferred_element_type=jnp.float32)
    return kernel


@jax.jit
def pallas_cross_attention(xq, xkv, wq, wk, wv, wo):
    """softmax((xq Wq)(xkv Wk)^T / sqrt(C)) (xkv Wv) Wo, fully fused."""
    B, M, C = xq.shape
    _, L, _ = xkv.shape
    scale = float(1.0 / (C ** 0.5))
    return pl.pallas_call(
        _xattn_kernel(B, scale),
        grid=(1,),
        in_specs=[
            pl.BlockSpec((B, M, C), lambda i: (0, 0, 0)),
            pl.BlockSpec((B, L, C), lambda i: (0, 0, 0)),
            pl.BlockSpec((C, C), lambda i: (0, 0)),
            pl.BlockSpec((C, C), lambda i: (0, 0)),
            pl.BlockSpec((C, C), lambda i: (0, 0)),
            pl.BlockSpec((C, C), lambda i: (0, 0)),
        ],
        out_specs=pl.BlockSpec((B, M, C), lambda i: (0, 0, 0)),
        out_shape=jax.ShapeDtypeStruct((B, M, C), jnp.float32),
        compiler_params=pltpu.CompilerParams(
            dimension_semantics=("arbitrary",),
            vmem_limit_bytes=_FUSED_VMEM),
    )(xq.astype(jnp.float32), xkv.astype(jnp.float32),
      wq.astype(jnp.bfloat16), wk.astype(jnp.bfloat16),
      wv.astype(jnp.bfloat16), wo.astype(jnp.bfloat16))


# ----------------------------------------------------------------------------
# Final 1-channel head + sigmoid on the VPU (lane-dense output, no N=1 matmul)
# ----------------------------------------------------------------------------

def _head_kernel(x_ref, w_ref, b_ref, o_ref):
    y = jnp.sum(x_ref[...] * w_ref[...], axis=-1) + b_ref[...]
    o_ref[...] = 1.0 / (1.0 + jnp.exp(-y))


@jax.jit
def pallas_head_sigmoid(x, w, b):
    B, H, W, Cin = x.shape
    HW = H * W
    out = pl.pallas_call(
        _head_kernel,
        grid=(1,),
        in_specs=[
            pl.BlockSpec((B, HW, Cin), lambda i: (0, 0, 0)),
            pl.BlockSpec((1, 1, Cin), lambda i: (0, 0, 0)),
            pl.BlockSpec((1, 1), lambda i: (0, 0)),
        ],
        out_specs=pl.BlockSpec((B, HW), lambda i: (0, 0)),
        out_shape=jax.ShapeDtypeStruct((B, HW), jnp.float32),
        compiler_params=pltpu.CompilerParams(dimension_semantics=("arbitrary",)),
    )(x.reshape(B, HW, Cin).astype(jnp.float32),
      w.reshape(1, 1, Cin).astype(jnp.float32),
      b.reshape(1, 1).astype(jnp.float32))
    return out.reshape(B, 1, H, W)


# ----------------------------------------------------------------------------
# Thin JAX glue
# ----------------------------------------------------------------------------

def im2col(x, k, stride, pad):
    """Only used for non-overlapping convs (stem k4s4, downsample k2s2)."""
    B, H, W, C = x.shape
    if pad > 0:
        x = jnp.pad(x, ((0, 0), (pad, pad), (pad, pad), (0, 0)))
    Hp, Wp = H + 2 * pad, W + 2 * pad
    Ho = (Hp - k) // stride + 1
    Wo = (Wp - k) // stride + 1
    cols = []
    for dy in range(k):
        for dx in range(k):
            cols.append(x[:, dy:dy + (Ho - 1) * stride + 1:stride,
                          dx:dx + (Wo - 1) * stride + 1:stride, :])
    return jnp.concatenate(cols, axis=-1), Ho, Wo


def conv2d(x, w, b, k, stride, pad, act="none"):
    patches, Ho, Wo = im2col(x, k, stride, pad)
    B = x.shape[0]
    y = pallas_matmul(patches.reshape(B * Ho * Wo, -1), w, b, act=act)
    return y.reshape(B, Ho, Wo, w.shape[1])


def linear(x, wmat, b, act="none"):
    lead = x.shape[:-1]
    y = pallas_matmul(x.reshape(-1, x.shape[-1]), wmat, b, act=act)
    return y.reshape(lead + (wmat.shape[1],))


def layernorm(x, wv, bv):
    lead = x.shape[:-1]
    C = x.shape[-1]
    y = pallas_layernorm(x.reshape(-1, C), wv, bv)
    return y.reshape(lead + (C,))


def up_bilinear_align_corners(x):
    """Bilinear x2 upsample, align_corners=True (matches nn.Upsample). NHWC."""
    B, H, W, C = x.shape
    Ho, Wo = 2 * H, 2 * W
    yi = jnp.zeros((Ho,), jnp.float32) if H == 1 else jnp.linspace(0.0, H - 1.0, Ho)
    xi = jnp.zeros((Wo,), jnp.float32) if W == 1 else jnp.linspace(0.0, W - 1.0, Wo)
    y0 = jnp.floor(yi).astype(jnp.int32); y1 = jnp.minimum(y0 + 1, H - 1)
    x0 = jnp.floor(xi).astype(jnp.int32); x1 = jnp.minimum(x0 + 1, W - 1)
    wy = (yi - y0.astype(jnp.float32))[None, :, None, None]
    wx = (xi - x0.astype(jnp.float32))[None, None, :, None]
    top = x[:, y0, :, :] * (1.0 - wy) + x[:, y1, :, :] * wy
    return top[:, :, x0, :] * (1.0 - wx) + top[:, :, x1, :] * wx


# ----------------------------------------------------------------------------
# Model pieces
# ----------------------------------------------------------------------------

def text_encoder(P, input_ids, attention_mask):
    # TODO(synk): pretrained BERT (AutoModel.from_pretrained) cannot be reproduced
    # without a checkpoint; a small deterministic 2-layer stand-in produces the
    # hidden_states list (only hidden_states[-1] is consumed by the forward pass).
    del attention_mask
    B, L = input_ids.shape
    h = P["tok_emb"][input_ids] + P["pos_emb"][:L][None, :, :]
    hidden_states = [h]
    for l in range(2):
        hn = layernorm(h, P[f"txt{l}_ln_w"], P[f"txt{l}_ln_b"])
        hn = linear(hn, P[f"txt{l}_w1"], P[f"txt{l}_b1"], act="gelu")
        h = h + hn
        hidden_states.append(h)
    return hidden_states


def convnext_block(x, P, pref):
    return pallas_convnext_block(
        x, P[pref + "dw_w"], P[pref + "dw_b"], P[pref + "ln_w"], P[pref + "ln_b"],
        P[pref + "pw1_w"], P[pref + "pw1_b"], P[pref + "pw2_w"], P[pref + "pw2_b"],
        P[pref + "gamma"])


def bridger(x, txt, P, pref):
    # TODO(synk): original Bridger source not provided; simplified bidirectional
    # cross-attention fusion with identical input/output shapes is used.
    B, H, W, C = x.shape
    v = x.reshape(B, H * W, C)
    t = linear(txt, P[pref + "tproj_w"], P[pref + "tproj_b"])     # (B, L, C)

    # vision attends to text (fused attention kernel)
    dv = pallas_cross_attention(v, t, P[pref + "q_w"], P[pref + "k_w"],
                                P[pref + "v_w"], P[pref + "o_w"])
    vis_feat = x + dv.reshape(B, H, W, C)

    # text attends to vision (fused attention kernel)
    dt = pallas_cross_attention(t, v, P[pref + "tq_w"], P[pref + "tk_w"],
                                P[pref + "tv_w"], P[pref + "to_w"])
    txt_feat = linear(dt, P[pref + "tback_w"], P[pref + "tback_b"])  # (B, L, 768)
    return vis_feat, txt_feat


def decoder_block(x, skip, P, pref):
    # TODO(synk): Decoder source not provided; standard UNet decoder assumed
    # (bilinear x2 upsample, concat skip, two 3x3 conv + inference-folded BN + ReLU).
    x = up_bilinear_align_corners(x)
    x = jnp.concatenate([skip, x], axis=-1)
    eps = 1e-5
    s1 = P[pref + "bn1_g"] / jnp.sqrt(1.0 + eps)     # running_var init = 1, mean = 0
    w1 = P[pref + "c1_w"] * s1[None, None, :]
    b1 = P[pref + "c1_b"] * s1 + P[pref + "bn1_b"]
    x = pallas_conv3x3(x, w1, b1, act="relu")
    s2 = P[pref + "bn2_g"] / jnp.sqrt(1.0 + eps)
    w2 = P[pref + "c2_w"] * s2[None, None, :]
    b2 = P[pref + "c2_b"] * s2 + P[pref + "bn2_b"]
    x = pallas_conv3x3(x, w2, b2, act="relu")
    return x


def subpixel_upsample(x, P):
    # TODO(synk): MONAI SubpixelUpsample assumed: 3x3 conv to C*r^2 then pixel shuffle (r=4).
    y = pallas_conv3x3(x, P["sub_w"], P["sub_b"])
    B, H, W, _ = y.shape
    r, Cout = 4, 24
    y = y.reshape(B, H, W, Cout, r, r)
    y = jnp.transpose(y, (0, 1, 4, 2, 5, 3))
    return y.reshape(B, H * r, W * r, Cout)


# ----------------------------------------------------------------------------
# Full forward
# ----------------------------------------------------------------------------

def mmiunet_v2_forward(P, image_nchw, input_ids, attention_mask):
    if image_nchw.shape[1] == 1:                       # repeat 'b 1 h w -> b 3 h w'
        image_nchw = jnp.repeat(image_nchw, 3, axis=1)
    image = jnp.transpose(image_nchw, (0, 2, 3, 1))    # NCHW -> NHWC

    hidden_states = text_encoder(P, input_ids, attention_mask)
    txt = hidden_states[-1]                            # (B, L, 768)

    encoder_feats = []

    # stage 1: stem (conv k4 s4 + channels-first LN) + blocks + fusion1
    x = conv2d(image, P["stem_w"], P["stem_b"], 4, 4, 0)
    x = layernorm(x, P["stem_ln_w"], P["stem_ln_b"])
    for j in range(DEPTHS[0]):
        x = convnext_block(x, P, f"st0_b{j}_")
    res = x
    vis_feat, txt_feat = bridger(x, txt, P, "fus1_")
    encoder_feats.append(vis_feat)

    # stages 2..4: downsample(LN + conv k2 s2) + blocks + fusion
    for s in range(1, 4):
        x = vis_feat + res
        x = layernorm(x, P[f"ds{s-1}_ln_w"], P[f"ds{s-1}_ln_b"])
        x = conv2d(x, P[f"ds{s-1}_w"], P[f"ds{s-1}_b"], 2, 2, 0)
        for j in range(DEPTHS[s]):
            x = convnext_block(x, P, f"st{s}_b{j}_")
        res = x
        vis_feat, txt_feat = bridger(x, txt + txt_feat, P, f"fus{s+1}_")
        encoder_feats.append(vis_feat)

    # decoder
    d4 = decoder_block(encoder_feats[3], encoder_feats[2], P, "dec4_")
    d3 = decoder_block(d4, encoder_feats[1], P, "dec3_")
    d2 = decoder_block(d3, encoder_feats[0], P, "dec2_")
    os1 = subpixel_upsample(d2, P)
    return pallas_head_sigmoid(os1, P["out_w"], P["out_b"])   # NCHW, sigmoid fused


# ----------------------------------------------------------------------------
# Deterministic parameter initialization
# ----------------------------------------------------------------------------

class _KeyGen:
    def __init__(self, seed):
        self._key = jax.random.PRNGKey(seed)

    def __call__(self):
        self._key, k = jax.random.split(self._key)
        return k


def init_params(seed=0):
    kg = _KeyGen(seed)

    def w(shape, std=0.02):
        return jax.random.normal(kg(), shape, jnp.float32) * std

    P = {}
    # stem
    P["stem_w"] = w((4 * 4 * 3, DIMS[0]))
    P["stem_b"] = jnp.zeros((DIMS[0],), jnp.float32)
    P["stem_ln_w"] = jnp.ones((DIMS[0],), jnp.float32)
    P["stem_ln_b"] = jnp.zeros((DIMS[0],), jnp.float32)
    # downsample layers 1..3
    for i in range(3):
        P[f"ds{i}_ln_w"] = jnp.ones((DIMS[i],), jnp.float32)
        P[f"ds{i}_ln_b"] = jnp.zeros((DIMS[i],), jnp.float32)
        P[f"ds{i}_w"] = w((2 * 2 * DIMS[i], DIMS[i + 1]))
        P[f"ds{i}_b"] = jnp.zeros((DIMS[i + 1],), jnp.float32)
    # ConvNeXt blocks
    for i in range(4):
        d = DIMS[i]
        for j in range(DEPTHS[i]):
            pref = f"st{i}_b{j}_"
            P[pref + "dw_w"] = w((7, 7, d))
            P[pref + "dw_b"] = jnp.zeros((d,), jnp.float32)
            P[pref + "ln_w"] = jnp.ones((d,), jnp.float32)
            P[pref + "ln_b"] = jnp.zeros((d,), jnp.float32)
            P[pref + "pw1_w"] = w((d, 4 * d))
            P[pref + "pw1_b"] = jnp.zeros((4 * d,), jnp.float32)
            P[pref + "pw2_w"] = w((4 * d, d))
            P[pref + "pw2_b"] = jnp.zeros((d,), jnp.float32)
            P[pref + "gamma"] = jnp.full((d,), 1e-6, jnp.float32)
    # text encoder stand-in
    P["tok_emb"] = w((VOCAB, TXT_DIM))
    P["pos_emb"] = w((MAX_POS, TXT_DIM))
    for l in range(2):
        P[f"txt{l}_ln_w"] = jnp.ones((TXT_DIM,), jnp.float32)
        P[f"txt{l}_ln_b"] = jnp.zeros((TXT_DIM,), jnp.float32)
        P[f"txt{l}_w1"] = w((TXT_DIM, TXT_DIM))
        P[f"txt{l}_b1"] = jnp.zeros((TXT_DIM,), jnp.float32)
    # bridgers (fusion1..4)
    for s, C in enumerate(CHANNELS, start=1):
        pref = f"fus{s}_"
        P[pref + "tproj_w"] = w((TXT_DIM, C))
        P[pref + "tproj_b"] = jnp.zeros((C,), jnp.float32)
        for n in ["q_w", "k_w", "v_w", "o_w", "tq_w", "tk_w", "tv_w", "to_w"]:
            P[pref + n] = w((C, C))
        P[pref + "tback_w"] = w((C, TXT_DIM))
        P[pref + "tback_b"] = jnp.zeros((TXT_DIM,), jnp.float32)
    # decoders (3x3 conv weights stored as (9, Cin, Cout) for the tap kernel)
    for idx, (cin, cout) in zip([4, 3, 2], [(768, 384), (384, 192), (192, 96)]):
        pref = f"dec{idx}_"
        P[pref + "c1_w"] = w((9, cin + cout, cout))
        P[pref + "c1_b"] = jnp.zeros((cout,), jnp.float32)
        P[pref + "bn1_g"] = jnp.ones((cout,), jnp.float32)
        P[pref + "bn1_b"] = jnp.zeros((cout,), jnp.float32)
        P[pref + "c2_w"] = w((9, cout, cout))
        P[pref + "c2_b"] = jnp.zeros((cout,), jnp.float32)
        P[pref + "bn2_g"] = jnp.ones((cout,), jnp.float32)
        P[pref + "bn2_b"] = jnp.zeros((cout,), jnp.float32)
    # SubpixelUpsample(2, 96, 24, 4) and UnetOutBlock(2, 24, 1)
    P["sub_w"] = w((9, 96, 24 * 16))
    P["sub_b"] = jnp.zeros((24 * 16,), jnp.float32)
    P["out_w"] = w((24, 1))
    P["out_b"] = jnp.zeros((1,), jnp.float32)
    return P


# ----------------------------------------------------------------------------

if __name__ == "__main__":
    key = jax.random.PRNGKey(0)
    k_img, k_ids = jax.random.split(key)

    image = jax.random.normal(k_img, (2, 3, 64, 64), jnp.float32)     # NCHW like PyTorch
    input_ids = jax.random.randint(k_ids, (2, 8), 0, VOCAB, jnp.int32)
    attention_mask = jnp.ones((2, 8), jnp.int32)

    params = init_params(seed=0)
    out = mmiunet_v2_forward(params, image, input_ids, attention_mask)
    out = jax.block_until_ready(out)

    assert out.shape == (2, 1, 64, 64), out.shape
    assert bool(jnp.all(jnp.isfinite(out)))
    assert bool(jnp.all((out >= 0.0) & (out <= 1.0)))   # sigmoid output
    print("KERNEL_OK")
</pallas_src>

<mosaic_0001>
module attributes {stable_mosaic.version = 11 : i64} {
  func.func @kernel(%arg0: i32, %arg1: memref<16x768xf32, #tpu.memory_space<vmem>>, %arg2: memref<1x768xf32, #tpu.memory_space<vmem>>, %arg3: memref<1x768xf32, #tpu.memory_space<vmem>>, %arg4: memref<16x768xf32, #tpu.memory_space<vmem>>) attributes {dimension_semantics = [#tpu.dimension_semantics<arbitrary>], iteration_bounds = array<i64: 1>, scalar_prefetch = 0 : i64, scratch_operands = 0 : i64, tpu.core_type = #tpu.core_type<tc>, window_params = [{pipeline_mode = #tpu.pipeline_mode<synchronous>, transform_indices = @transform_0, window_bounds = array<i64: 16, 768>}, {pipeline_mode = #tpu.pipeline_mode<synchronous>, transform_indices = @transform_1, window_bounds = array<i64: 1, 768>}, {pipeline_mode = #tpu.pipeline_mode<synchronous>, transform_indices = @transform_2, window_bounds = array<i64: 1, 768>}, {pipeline_mode = #tpu.pipeline_mode<synchronous>, transform_indices = @transform_3, window_bounds = array<i64: 16, 768>}]} {
    %c0 = arith.constant 0 : index
    %c0_0 = arith.constant 0 : index
    %0 = vector.load %arg1[%c0, %c0_0] : memref<16x768xf32, #tpu.memory_space<vmem>>, vector<16x768xf32>
    %cst = arith.constant dense<0.000000e+00> : vector<16xf32>
    %1 = vector.multi_reduction <add>, %0, %cst [1] : vector<16x768xf32> to vector<16xf32>
    %2 = vector.shape_cast %1 : vector<16xf32> to vector<16x1xf32>
    %cst_1 = arith.constant 7.680000e+02 : f32
    %3 = vector.broadcast %cst_1 : f32 to vector<16x1xf32>
    %4 = arith.divf %2, %3 : vector<16x1xf32>
    %5 = vector.broadcast %4 : vector<16x1xf32> to vector<16x768xf32>
    %6 = arith.subf %0, %5 : vector<16x768xf32>
    %7 = arith.mulf %6, %6 : vector<16x768xf32>
    %cst_2 = arith.constant dense<0.000000e+00> : vector<16xf32>
    %8 = vector.multi_reduction <add>, %7, %cst_2 [1] : vector<16x768xf32> to vector<16xf32>
    %9 = vector.shape_cast %8 : vector<16xf32> to vector<16x1xf32>
    %cst_3 = arith.constant 7.680000e+02 : f32
    %10 = vector.broadcast %cst_3 : f32 to vector<16x1xf32>
    %11 = arith.divf %9, %10 : vector<16x1xf32>
    %cst_4 = arith.constant 9.99999997E-7 : f32
    %12 = vector.broadcast %cst_4 : f32 to vector<16x1xf32>
    %13 = arith.addf %11, %12 : vector<16x1xf32>
    %14 = math.rsqrt %13 : vector<16x1xf32>
    %15 = vector.broadcast %14 : vector<16x1xf32> to vector<16x768xf32>
    %16 = arith.mulf %6, %15 : vector<16x768xf32>
    %c0_5 = arith.constant 0 : index
    %c0_6 = arith.constant 0 : index
    %17 = vector.load %arg2[%c0_5, %c0_6] : memref<1x768xf32, #tpu.memory_space<vmem>>, vector<1x768xf32>
    %18 = vector.broadcast %17 : vector<1x768xf32> to vector<16x768xf32>
    %19 = arith.mulf %16, %18 : vector<16x768xf32>
    %c0_7 = arith.constant 0 : index
    %c0_8 = arith.constant 0 : index
    %20 = vector.load %arg3[%c0_7, %c0_8] : memref<1x768xf32, #tpu.memory_space<vmem>>, vector<1x768xf32>
    %21 = vector.broadcast %20 : vector<1x768xf32> to vector<16x768xf32>
    %22 = arith.addf %19, %21 : vector<16x768xf32>
    %c0_9 = arith.constant 0 : index
    %c0_10 = arith.constant 0 : index
    %23 = vector.load %arg4[%c0_9, %c0_10] : memref<16x768xf32, #tpu.memory_space<vmem>>, vector<16x768xf32>
    tpu.vector_store %arg4[%c0_9, %c0_10], %22 {strides = array<i32>} : memref<16x768xf32, #tpu.memory_space<vmem>>, vector<16x768xf32>,
    return
  }
  func.func @transform_0(%arg0: i32) -> (i32, i32) {
    %c0_i32 = arith.constant 0 : i32
    %c0_i32_0 = arith.constant 0 : i32
    %c0_i32_1 = arith.constant 0 : i32
    return %c0_i32, %c0_i32_0 : i32, i32
  }
  func.func @transform_1(%arg0: i32) -> (i32, i32) {
    %c0_i32 = arith.constant 0 : i32
    %c0_i32_0 = arith.constant 0 : i32
    %c0_i32_1 = arith.constant 0 : i32
    return %c0_i32, %c0_i32_0 : i32, i32
  }
  func.func @transform_2(%arg0: i32) -> (i32, i32) {
    %c0_i32 = arith.constant 0 : i32
    %c0_i32_0 = arith.constant 0 : i32
    %c0_i32_1 = arith.constant 0 : i32
    return %c0_i32, %c0_i32_0 : i32, i32
  }
  func.func @transform_3(%arg0: i32) -> (i32, i32) {
    %c0_i32 = arith.constant 0 : i32
    %c0_i32_0 = arith.constant 0 : i32
    %c0_i32_1 = arith.constant 0 : i32
    return %c0_i32, %c0_i32_0 : i32, i32
  }
}

</mosaic_0001>

<bundles_post_ra>
// kernel: pallas_layernorm.1
= control target key start
LH: loop header
LB: loop body
LE: loop exit
PB: predicated region body
PF: predicated region fallthrough
CT: control target
= control target key end

     0   :  { %8 = vsyncpa [#allocation3], 0  ;;  %s405_s0 = inlined_call_operand.hbm [shape: f32[16,768], index: 0, kind: input, shape index: {}]   ;;  %s406_s1 = inlined_call_operand.vmem [shape: f32[1,768], index: 1, kind: input, shape index: {}]   ;;  %s407_s2 = inlined_call_operand.vmem [shape: f32[1,768], index: 2, kind: input, shape index: {}]   ;;  %s408_s3 = inlined_call_operand.hbm [shape: f32[16,768], index: 3, kind: output, shape index: {}]  }
   0x1   :  { %9 = vsyncpa [#allocation4], 0  ;;  %s14_s14 = sshll.u32 %s405_s0, 4  ;;  %s286_s15 = smov [#allocation2]   ;;  %s15_s14 = int_to_ptr.hbm [resolvable:$true] %s14_s14 }
   0x2   :  { %s16_s16 = sshll.u32 %s286_s15, 4  ;;  %s287_s17 = smov 768   ;;  %s17_s16 = int_to_ptr.vmem [resolvable:$true] %s16_s16 }
   0x3   :  { %s288_s18 = smov 48  }
   0x4   :  { %22 = dma.hbm_to_vmem [thread:$0]  %s15_s14, 1536, %s17_s16, [#allocation3], %s287_s17, %s287_s17, %s288_s18  }
   0x5   :  { %282 = dma.done.wait [#allocation3], 1536  }
   0x6   :  { %283 = vsyncadd [#allocation3], 4294965760  ;;  %v31_v0 = vld [vmem:[#allocation2] sm:$0xff]  ;;  %v32_v1 = vld [vmem:[#allocation2 + $0x8] sm:$0xff]  ;;  %v289_v22 = vmov 768.0   ;;  %s210_s24 = sshll.u32 %s408_s3, 4  ;;  %s211_s24 = int_to_ptr.hbm [resolvable:$true] %s210_s24 }
   0x7   :  { %v33_v2 = vld [vmem:[#allocation2 + $0x10] sm:$0xff]  ;;  %v34_v3 = vld [vmem:[#allocation2 + $0x18] sm:$0xff]  ;;  %v43_v4 = vadd.f32 %v32_v1, %v31_v0  ;;  %v39_v7 = vld [vmem:[#allocation2 + $0x40] sm:$0xff]  ;;  %228 = vrcp.f32 %v289_v22 }
   0x8   :  { %v37_v5 = vld [vmem:[#allocation2 + $0x30] sm:$0xff]  ;;  %v38_v6 = vld [vmem:[#allocation2 + $0x38] sm:$0xff]  ;;  %v35_v10 = vld [vmem:[#allocation2 + $0x20] sm:$0xff] }
   0x9   :  { %v44_v8 = vadd.f32 %v43_v4, %v33_v2  ;;  %v50_v9 = vadd.f32 %v38_v6, %v37_v5  ;;  %v40_v11 = vld [vmem:[#allocation2 + $0x48] sm:$0xff]  ;;  %v41_v17 = vld [vmem:[#allocation2 + $0x50] sm:$0xff]  ;;  %v42_v20 = vld [vmem:[#allocation2 + $0x58] sm:$0xff] }
   0xa   :  { %v36_v14 = vld [vmem:[#allocation2 + $0x28] sm:$0xff] }
   0xb   :  { %v45_v12 = vadd.f32 %v44_v8, %v34_v3  ;;  %v51_v13 = vadd.f32 %v50_v9, %v39_v7 }
   0xd   :  { %v46_v15 = vadd.f32 %v45_v12, %v35_v10  ;;  %v52_v16 = vadd.f32 %v51_v13, %v40_v11  ;;  %v229_v23 = vpop.eup %228  ;;  %v368_v12 = vld [vmem:[%s406_s1] sm:$0x3f]  ;;  %s290_s1 = smov [#allocation5]  }
   0xe   :  { %v58_v24 = vmul.f32 768.0, %v229_v23  ;;  %vm62_vm0 = vweird.f32 %v229_v23 }
   0xf   :  { %v47_v18 = vadd.f32 %v46_v15, %v36_v14  ;;  %v53_v19 = vadd.f32 %v52_v16, %v41_v17 }
  0x10   :  { %v59_v25 = vsub.f32 1.0, %v58_v24  ;;  %v147_v24 = vperm.slane %v368_v12, 5 }
  0x11   :  { %48 = vadd.xlane.f32.xlu0 %v47_v18  ;;  %v54_v21 = vadd.f32 %v53_v19, %v42_v20  ;;  %v143_v18 = vperm.slane %v368_v12, 1  ;;  %v144_v19 = vperm.slane %v368_v12, 2 }
  0x12   :  { %v60_v26 = vmul.f32 %v229_v23, %v59_v25 }
  0x14   :  { %v61_v27 = vadd.f32 %v229_v23, %v60_v26 }
  0x16   :  { %v63_v28 = vsel %vm62_vm0, %v229_v23, %v61_v27 }
  0x19   :  { %55 = vadd.xlane.f32.xlu0 %v54_v21  ;;  %v146_v21 = vperm.slane %v368_v12, 4 }
  0x84   :  { %v49_v29 = vpop.xlane.xlu0 %48 }
  0x85   :  { %v64_v30 = vmul.f32 %v63_v28, %v49_v29 }
  0x87   :  { %v317_v31 = vsub.f32 %v31_v0, %v64_v30  ;;  %v319_v32 = vsub.f32 %v32_v1, %v64_v30  ;;  %v321_v33 = vsub.f32 %v33_v2, %v64_v30  ;;  %v323_v34 = vsub.f32 %v34_v3, %v64_v30 }
  0x88   :  { %v329_v37 = vsub.f32 %v35_v10, %v64_v30  ;;  %v333_v41 = vsub.f32 %v36_v14, %v64_v30  ;;  %v373_v14 = vld [vmem:[%s407_s2] sm:$0x3f]  ;;  %s208_s2 = sshll.u32 %s290_s1, 4  ;;  %s209_s2 = int_to_ptr.vmem [resolvable:$true] %s208_s2 }
  0x89   :  { %v78_v35 = vmul.f32 %v317_v31, %v317_v31  ;;  %v79_v36 = vmul.f32 %v319_v32, %v319_v32  ;;  %v80_v38 = vmul.f32 %v321_v33, %v321_v33  ;;  %v81_v43 = vmul.f32 %v323_v34, %v323_v34 }
  0x8a   :  { %v82_v45 = vmul.f32 %v329_v37, %v329_v37  ;;  %v83_v50 = vmul.f32 %v333_v41, %v333_v41  ;;  %v168_v25 = vperm.slane %v373_v14, 0  ;;  %v169_v26 = vperm.slane %v373_v14, 1 }
  0x8b   :  { %v90_v39 = vadd.f32 %v79_v36, %v78_v35  ;;  %v170_v27 = vperm.slane %v373_v14, 2  ;;  %v172_v29 = vperm.slane %v373_v14, 4 }
  0x8c   :  { %v56_v40 = vpop.xlane.xlu0 %55 }
  0x8d   :  { %v65_v42 = vmul.f32 %v63_v28, %v56_v40  ;;  %v91_v44 = vadd.f32 %v90_v39, %v80_v38 }
  0x8f   :  { %v92_v46 = vadd.f32 %v91_v44, %v81_v43  ;;  %v339_v47 = vsub.f32 %v37_v5, %v65_v42  ;;  %v341_v48 = vsub.f32 %v38_v6, %v65_v42  ;;  %v343_v49 = vsub.f32 %v39_v7, %v65_v42 }
  0x90   :  { %v347_v52 = vsub.f32 %v40_v11, %v65_v42  ;;  %v353_v56 = vsub.f32 %v41_v17, %v65_v42  ;;  %v357_v59 = vsub.f32 %v42_v20, %v65_v42  ;;  %v142_v17 = vperm.slane %v368_v12, 0 }
  0x91   :  { %v93_v51 = vadd.f32 %v92_v46, %v82_v45  ;;  %v84_v53 = vmul.f32 %v339_v47, %v339_v47  ;;  %v85_v54 = vmul.f32 %v341_v48, %v341_v48  ;;  %v86_v57 = vmul.f32 %v343_v49, %v343_v49 }
  0x92   :  { %v87_v60 = vmul.f32 %v347_v52, %v347_v52  ;;  %v88_v62 = vmul.f32 %v353_v56, %v353_v56  ;;  %v89_v0 = vmul.f32 %v357_v59, %v357_v59  ;;  %v145_v20 = vperm.slane %v368_v12, 3 }
  0x93   :  { %v94_v55 = vadd.f32 %v93_v51, %v83_v50  ;;  %v97_v58 = vadd.f32 %v85_v54, %v84_v53  ;;  %v173_v42 = vperm.slane %v373_v14, 5 }
  0x95   :  { %95 = vadd.xlane.f32.xlu1 %v94_v55  ;;  %v98_v61 = vadd.f32 %v97_v58, %v86_v57 }
  0x97   :  { %v99_v63 = vadd.f32 %v98_v61, %v87_v60 }
  0x99   :  { %v100_v1 = vadd.f32 %v99_v63, %v88_v62 }
  0x9b   :  { %v101_v2 = vadd.f32 %v100_v1, %v89_v0 }
  0x9d   :  { %102 = vadd.xlane.f32.xlu1 %v101_v2 }
 0x108   :  { %v96_v3 = vpop.xlane.xlu1 %95 }
 0x109   :  { %v104_v4 = vmul.f32 %v96_v3, %v63_v28 }
 0x10b   :  { %v106_v5 = vadd.f32 1e-06, %v104_v4 }
 0x10d   :  { %230 = vrsqrt.f32 %v106_v5  ;;  %vm114_vm2 = vweird.f32 %v106_v5 }
 0x110   :  { %v103_v6 = vpop.xlane.xlu1 %102 }
 0x111   :  { %v105_v7 = vmul.f32 %v103_v6, %v63_v28  ;;  %v171_v28 = vperm.slane %v373_v14, 3 }
 0x113   :  { %v231_v8 = vpop.eup %230  ;;  %v107_v9 = vadd.f32 1e-06, %v105_v7 }
 0x114   :  { %v109_v10 = vmul.f32 %v231_v8, %v106_v5  ;;  %vm115_vm1 = vweird.f32 %v231_v8 }
 0x115   :  { %232 = vrsqrt.f32 %v107_v9  ;;  %vm116_vm3 = vmor %vm114_vm2, %vm115_vm1  ;;  %vm124_vm5 = vweird.f32 %v107_v9 }
 0x116   :  { %v110_v11 = vmul.f32 %v231_v8, %v109_v10 }
 0x118   :  { %v111_v13 = vmul.f32 0.5, %v110_v11 }
 0x11a   :  { %v112_v15 = vsub.f32 1.5, %v111_v13 }
 0x11b   :  { %v233_v16 = vpop.eup %232 }
 0x11c   :  { %v113_v22 = vmul.f32 %v231_v8, %v112_v15  ;;  %v119_v23 = vmul.f32 %v233_v16, %v107_v9  ;;  %vm125_vm4 = vweird.f32 %v233_v16 }
 0x11d   :  { %vm126_vm6 = vmor %vm124_vm5, %vm125_vm4 }
 0x11e   :  { %v117_v30 = vsel %vm116_vm3, %v231_v8, %v113_v22  ;;  %v120_v35 = vmul.f32 %v233_v16, %v119_v23 }
 0x11f   :  { %v128_v36 = vmul.f32 %v117_v30, %v317_v31  ;;  %v129_v38 = vmul.f32 %v117_v30, %v319_v32  ;;  %v130_v39 = vmul.f32 %v117_v30, %v321_v33  ;;  %v131_v40 = vmul.f32 %v117_v30, %v323_v34 }
 0x120   :  { %v132_v43 = vmul.f32 %v117_v30, %v329_v37  ;;  %v133_v44 = vmul.f32 %v117_v30, %v333_v41  ;;  %v121_v45 = vmul.f32 0.5, %v120_v35 }
 0x121   :  { %v154_v46 = vmul.f32 %v142_v17, %v128_v36  ;;  %v155_v50 = vmul.f32 %v143_v18, %v129_v38  ;;  %v156_v51 = vmul.f32 %v144_v19, %v130_v39  ;;  %v157_v53 = vmul.f32 %v145_v20, %v131_v40 }
 0x122   :  { %v158_v54 = vmul.f32 %v146_v21, %v132_v43  ;;  %v159_v55 = vmul.f32 %v147_v24, %v133_v44  ;;  %v122_v31 = vsub.f32 1.5, %v121_v45 }
 0x123   :  { %v180_v32 = vadd.f32 %v168_v25, %v154_v46  ;;  %v181_v57 = vadd.f32 %v169_v26, %v155_v50  ;;  %v182_v33 = vadd.f32 %v170_v27, %v156_v51  ;;  %v183_v58 = vadd.f32 %v171_v28, %v157_v53 }
 0x124   :  { %v123_v34 = vmul.f32 %v233_v16, %v122_v31  ;;  %v184_v60 = vadd.f32 %v172_v29, %v158_v54  ;;  %v185_v37 = vadd.f32 %v173_v42, %v159_v55 }
 0x125   :  { %192 = vst [vmem:[#allocation5] sm:$0xff] %v180_v32 }
 0x126   :  { %193 = vst [vmem:[#allocation5 + $0x8] sm:$0xff] %v181_v57  ;;  %v127_v41 = vsel %vm126_vm6, %v233_v16, %v123_v34 }
 0x127   :  { %194 = vst [vmem:[#allocation5 + $0x10] sm:$0xff] %v182_v33  ;;  %v134_v61 = vmul.f32 %v127_v41, %v339_v47  ;;  %v135_v62 = vmul.f32 %v127_v41, %v341_v48  ;;  %v136_v63 = vmul.f32 %v127_v41, %v343_v49  ;;  %v137_v0 = vmul.f32 %v127_v41, %v347_v52 }
 0x128   :  { %195 = vst [vmem:[#allocation5 + $0x18] sm:$0xff] %v183_v58  ;;  %v138_v1 = vmul.f32 %v127_v41, %v353_v56  ;;  %v139_v2 = vmul.f32 %v127_v41, %v357_v59 }
 0x129   :  { %196 = vst [vmem:[#allocation5 + $0x20] sm:$0xff] %v184_v60  ;;  %v160_v3 = vmul.f32 %v142_v17, %v134_v61  ;;  %v161_v4 = vmul.f32 %v143_v18, %v135_v62  ;;  %v162_v5 = vmul.f32 %v144_v19, %v136_v63  ;;  %v163_v6 = vmul.f32 %v145_v20, %v137_v0 }
 0x12a   :  { %197 = vst [vmem:[#allocation5 + $0x28] sm:$0xff] %v185_v37  ;;  %v164_v7 = vmul.f32 %v146_v21, %v138_v1  ;;  %v165_v8 = vmul.f32 %v147_v24, %v139_v2 }
 0x12b   :  { %v186_v47 = vadd.f32 %v168_v25, %v160_v3  ;;  %v187_v9 = vadd.f32 %v169_v26, %v161_v4  ;;  %v188_v48 = vadd.f32 %v170_v27, %v162_v5  ;;  %v189_v10 = vadd.f32 %v171_v28, %v163_v6 }
 0x12c   :  { %v190_v49 = vadd.f32 %v172_v29, %v164_v7  ;;  %v191_v52 = vadd.f32 %v173_v42, %v165_v8 }
 0x12d   :  { %198 = vst [vmem:[#allocation5 + $0x30] sm:$0xff] %v186_v47 }
 0x12e   :  { %199 = vst [vmem:[#allocation5 + $0x38] sm:$0xff] %v187_v9 }
 0x12f   :  { %200 = vst [vmem:[#allocation5 + $0x40] sm:$0xff] %v188_v48 }
 0x130   :  { %201 = vst [vmem:[#allocation5 + $0x48] sm:$0xff] %v189_v10 }
 0x131   :  { %202 = vst [vmem:[#allocation5 + $0x50] sm:$0xff] %v190_v49 }
 0x132   :  { %203 = vst [vmem:[#allocation5 + $0x58] sm:$0xff] %v191_v52 }
 0x133   :  { %216 = dma.vmem_to_hbm [thread:$0]  %s209_s2, 1536, %s211_s24, [#allocation4], %s287_s17, %s287_s17, %s288_s18  }
 0x134   :  { %284 = dma.done.wait [#allocation4], 1536  }
 0x135   :  { %285 = vsyncadd [#allocation4], 4294965760 }
 0x136   :  { %221 = vsyncpa [#allocation3], 1 }
 0x137   :  { %222 = vsyncpa [#allocation4], 1 }

</bundles_post_ra>
